<compile_context>
chip_gen: v6e
topology: v6e:2x2x1
jax: 0.10.0
libtpu: 0.0.40
codegen_flags: <defaults>
</compile_context>

<pallas_src>
import functools

import jax
import jax.numpy as jnp
from jax.experimental import pallas as pl
from jax.experimental.pallas import tpu as pltpu


# ----------------------------- fused forward kernel -----------------------------
def make_fused_kernel(T, Sb):
    """Fused char-CNN -> BiLSTM (single fused-direction recurrence) -> fc ->
    log_softmax kernel.  T = B (LSTM time axis, batch_first=False quirk),
    Sb = max_len_sentence (LSTM "batch")."""

    def kernel(xwin_ref, wvec_ref, convw_ref, convb_ref,
               wih_ref, whh_ref, bias_ref, fcw_ref, fcb_ref, o_ref):
        N = wvec_ref.shape[0]                 # B * S  (= T * Sb)
        W = xwin_ref.shape[0] // N            # max_len_word
        E = wvec_ref.shape[1]                 # word_emb_dim
        H2 = whh_ref.shape[0]                 # 2 * lstm_hidden_dim (= 128)
        H = H2 // 2
        G8 = whh_ref.shape[1]                 # 8H = 4 gate-groups of 2H lanes

        # ---- char CNN: single im2col matmul + ReLU, balanced-tree max-over-time --
        conv = jnp.dot(xwin_ref[...], convw_ref[...],
                       preferred_element_type=jnp.float32) + convb_ref[...]
        conv = jnp.maximum(conv, 0.0)                         # (W*N, C_out), w-major rows
        blocks = [conv[w * N:(w + 1) * N, :] for w in range(W)]
        while len(blocks) > 1:                                # depth ceil(log2(W))
            nxt = [jnp.maximum(blocks[i], blocks[i + 1])
                   for i in range(0, len(blocks) - 1, 2)]
            if len(blocks) % 2:
                nxt.append(blocks[-1])
            blocks = nxt
        cf = blocks[0]                                        # (N, C_out)

        # ---- BiLSTM input projection (both directions), biases pre-added once ----
        # wih packs both directions in fused-gate column layout
        # [i_f,i_b | f_f,f_b | o_f,o_b | g_f,g_b]; row-split matmul avoids a lane
        # concat of [word_vec, char_feat].
        xproj = (jnp.dot(wvec_ref[...], wih_ref[0:E, :],
                         preferred_element_type=jnp.float32)
                 + jnp.dot(cf, wih_ref[E:, :], preferred_element_type=jnp.float32)
                 + bias_ref[...])                             # (N, 8H)

        # ---- fused fwd+bwd recurrence: ONE (Sb,2H)x(2H,8H) matmul per step -------
        # h / c lane layout: [h_fwd (H) | h_bwd (H)]  (2H = 128 = one lane tile).
        # At fused step t the fwd direction consumes input time t, the bwd
        # direction consumes input time T-1-t; select per gate-group half-lanes.
        lane = jax.lax.broadcasted_iota(jnp.int32, (Sb, G8), 1)
        if (H & (H - 1)) == 0:                                # H power of two (default 64)
            fwd_lane = (lane & H) == 0
        else:
            fwd_lane = (lane % H2) < H
        x_steps = [jnp.where(fwd_lane,
                             xproj[t * Sb:(t + 1) * Sb, :],
                             xproj[(T - 1 - t) * Sb:(T - t) * Sb, :])
                   for t in range(T)]                          # off the critical path

        whh = whh_ref[...]                                     # (2H, 8H) block-diagonal
        h = jnp.zeros((Sb, H2), jnp.float32)
        c = jnp.zeros((Sb, H2), jnp.float32)
        hs = []
        for t in range(T):                                     # static unroll; T = batch B
            gates = x_steps[t] + jnp.dot(h, whh, preferred_element_type=jnp.float32)
            sg = jax.nn.sigmoid(gates[:, 0:3 * H2])            # i, f, o  (one EUP region)
            gg = jnp.tanh(gates[:, 3 * H2:4 * H2])             # g        (one EUP region)
            i_g = sg[:, 0:H2]
            f_g = sg[:, H2:2 * H2]
            o_g = sg[:, 2 * H2:3 * H2]
            c = f_g * c + i_g * gg
            h = o_g * jnp.tanh(c)
            hs.append(h)

        # ---- assemble lane-dense (N, 2H) BiLSTM output AFTER the loop ------------
        # output time t: fwd half from step t, bwd half from step T-1-t.
        fwd_half = jax.lax.broadcasted_iota(jnp.int32, (Sb, H2), 1) < H
        hcat = jnp.concatenate(
            [jnp.where(fwd_half, hs[t], hs[T - 1 - t]) for t in range(T)], axis=0)

        # ---- fc + log_softmax, lane-dense (target padded to P=128 lanes) ---------
        # Padded weight columns are 0 and padded bias columns are -1e30, so they
        # contribute exp(..) == 0 and never win the row max.
        logits = (jnp.dot(hcat, fcw_ref[...],
                          preferred_element_type=jnp.float32) + fcb_ref[...])  # (N, P)
        m = jnp.max(logits, axis=-1, keepdims=True)
        s = logits - m
        lse = jnp.log(jnp.sum(jnp.exp(s), axis=-1, keepdims=True))
        o_ref[...] = s - lse

    return kernel


def fused_forward(xwin, word_flat, conv_w, conv_b, wih_bi, whh_bd, b_bi,
                  fc_w_pad, fc_b_pad, *, T, Sb):
    N = word_flat.shape[0]
    P = fc_w_pad.shape[1]
    vmem = lambda: pl.BlockSpec(memory_space=pltpu.MemorySpace.VMEM)
    return pl.pallas_call(
        make_fused_kernel(T, Sb),
        out_shape=jax.ShapeDtypeStruct((N, P), jnp.float32),
        in_specs=[vmem() for _ in range(9)],
        out_specs=vmem(),
    )(xwin, word_flat, conv_w, conv_b, wih_bi, whh_bd, b_bi, fc_w_pad, fc_b_pad)


# ----------------------------------- params ------------------------------------
def init_params(key, vocab_size, char_size, target_size,
                word_emb_dim=32, char_emb_dim=8, out_channels=16,
                kernel_size=3, lstm_hidden_dim=64):
    ks = jax.random.split(key, 12)
    F = word_emb_dim + out_channels
    H = lstm_hidden_dim

    def u(k, shape, scale=0.1):
        return jax.random.uniform(k, shape, jnp.float32, -scale, scale)

    return dict(
        word_emb=jax.random.normal(ks[0], (vocab_size, word_emb_dim), jnp.float32),
        char_emb=jax.random.normal(ks[1], (char_size, char_emb_dim), jnp.float32),
        # Conv1d weight flattened from PyTorch (C_out, C_in, K) to (K*C_in, C_out),
        # row index = k*C_in + c (matches the im2col window layout).
        conv_w=u(ks[2], (kernel_size * char_emb_dim, out_channels)),
        conv_b=u(ks[3], (1, out_channels)),
        # Fused-gate LSTM weights, PyTorch gate order (i, f, g, o) along lanes.
        wih_f=u(ks[4], (F, 4 * H)),
        wih_b=u(ks[5], (F, 4 * H)),
        whh_f=u(ks[6], (H, 4 * H)),
        whh_b=u(ks[7], (H, 4 * H)),
        b_f=u(ks[8], (1, 4 * H)),       # b_ih + b_hh pre-summed
        b_b=u(ks[9], (1, 4 * H)),
        fc_w=u(ks[10], (2 * H, target_size)),
        fc_b=u(ks[11], (1, target_size)),
    )


def _fuse_gate_cols(wf, wb, H):
    """(X,4H) fwd + (X,4H) bwd with PyTorch gate order (i,f,g,o) along columns
    -> (X,8H) fused layout [i_f,i_b | f_f,f_b | o_f,o_b | g_f,g_b]
    (each gate group = 2H lanes, fwd in the lower H, bwd in the upper H)."""
    order = (0, 1, 3, 2)                       # i, f, o, g
    parts = []
    for g in order:
        parts.append(wf[:, g * H:(g + 1) * H])
        parts.append(wb[:, g * H:(g + 1) * H])
    return jnp.concatenate(parts, axis=1)


def prepare_params(params, lane_width=128):
    """One-time layout transform for the fused kernel (run once, outside jit)."""
    p = dict(params)
    H = params["whh_f"].shape[0]
    # Fused input projection weights / biases (both directions, gate-interleaved).
    p["wih_bi"] = _fuse_gate_cols(params["wih_f"], params["wih_b"], H)      # (F, 8H)
    p["b_bi"] = _fuse_gate_cols(params["b_f"], params["b_b"], H)            # (1, 8H)
    # Block-diagonal recurrent weight: rows [h_fwd | h_bwd] -> fused gate columns.
    z = jnp.zeros_like(params["whh_f"])
    p["whh_bd"] = _fuse_gate_cols(jnp.concatenate([params["whh_f"], z], axis=0),
                                  jnp.concatenate([z, params["whh_b"]], axis=0),
                                  H)                                         # (2H, 8H)
    # Lane-dense padded classifier.
    tgt = params["fc_w"].shape[1]
    P = ((tgt + lane_width - 1) // lane_width) * lane_width
    p["fc_w_pad"] = jnp.pad(params["fc_w"], ((0, 0), (0, P - tgt)))
    p["fc_b_pad"] = jnp.pad(params["fc_b"], ((0, 0), (0, P - tgt)),
                            constant_values=-1e30)
    return p


# ---------------------------------- model glue ----------------------------------
def pos_tag_net_forward(params, words, word_mask, chars, char_mask,
                        *, max_len_word, max_len_sentence, target_size):
    B, S = words.shape
    assert S == max_len_sentence
    W = max_len_word
    N = B * S
    C_in = params["char_emb"].shape[1]
    K = params["conv_w"].shape[0] // C_in

    # Ragged Python-list batching of the PyTorch code is emulated with index arrays
    # + masks: masked positions contribute exact zero embeddings (== torch.zeros pad).
    word_flat = (params["word_emb"][words] * word_mask[..., None]).reshape(N, -1)
    char_vecs = (params["char_emb"][chars] * char_mask[..., None]).reshape(N, W, C_in)

    # im2col for Conv1d(padding=K//2): windows flattened to (W*N, K*C_in), rows
    # w-major so the in-kernel max-over-time is a contiguous block reduction.
    # TODO(synk): at production size build this in-kernel as K shifted matmuls.
    pad = K // 2
    char_pad = jnp.pad(char_vecs, ((0, 0), (pad, pad), (0, 0)))
    xwin = jnp.concatenate([char_pad[:, k:k + W, :] for k in range(K)], axis=-1)
    xwin = jnp.transpose(xwin, (1, 0, 2)).reshape(W * N, K * C_in)

    out = fused_forward(xwin, word_flat, params["conv_w"], params["conv_b"],
                        params["wih_bi"], params["whh_bd"], params["b_bi"],
                        params["fc_w_pad"], params["fc_b_pad"],
                        T=B, Sb=S)                    # (N, 128) lane-dense log-probs
    return out[:, :target_size].reshape(B, S, target_size)


if __name__ == "__main__":
    B, S, W = 2, 8, 16                     # batch, max_len_sentence, max_len_word
    vocab_size, char_size, target_size = 50, 30, 10

    key = jax.random.PRNGKey(0)
    k_par, k_w, k_c, k_len = jax.random.split(key, 4)
    params = prepare_params(init_params(k_par, vocab_size, char_size, target_size))

    words = jax.random.randint(k_w, (B, S), 0, vocab_size, jnp.int32)
    chars = jax.random.randint(k_c, (B, S, W), 0, char_size, jnp.int32)
    sent_lens = jnp.array([S, 5], jnp.int32)                            # variable sentence lengths
    word_lens = jax.random.randint(k_len, (B, S), 3, W + 1, jnp.int32)  # variable word lengths
    word_mask = (jnp.arange(S)[None, :] < sent_lens[:, None]).astype(jnp.float32)
    char_mask = ((jnp.arange(W)[None, None, :] < word_lens[:, :, None]).astype(jnp.float32)
                 * word_mask[..., None])

    fwd = jax.jit(functools.partial(pos_tag_net_forward,
                                    max_len_word=W, max_len_sentence=S,
                                    target_size=target_size))
    out = fwd(params, words, word_mask, chars, char_mask)
    out = jax.block_until_ready(out)

    assert out.shape == (B, S, target_size)
    assert bool(jnp.all(jnp.isfinite(out)))
    print("KERNEL_OK")
</pallas_src>

<mosaic_0001>
module attributes {stable_mosaic.version = 11 : i64} {
  func.func @kernel(%arg0: memref<256x24xf32, #tpu.memory_space<vmem>>, %arg1: memref<16x32xf32, #tpu.memory_space<vmem>>, %arg2: memref<24x16xf32, #tpu.memory_space<vmem>>, %arg3: memref<1x16xf32, #tpu.memory_space<vmem>>, %arg4: memref<48x512xf32, #tpu.memory_space<vmem>>, %arg5: memref<128x512xf32, #tpu.memory_space<vmem>>, %arg6: memref<1x512xf32, #tpu.memory_space<vmem>>, %arg7: memref<128x128xf32, #tpu.memory_space<vmem>>, %arg8: memref<1x128xf32, #tpu.memory_space<vmem>>, %arg9: memref<16x128xf32, #tpu.memory_space<vmem>>) attributes {dimension_semantics = [], scalar_prefetch = 0 : i64, scratch_operands = 0 : i64, tpu.core_type = #tpu.core_type<tc>} {
    %c0 = arith.constant 0 : index
    %c0_0 = arith.constant 0 : index
    %0 = vector.load %arg0[%c0, %c0_0] : memref<256x24xf32, #tpu.memory_space<vmem>>, vector<256x24xf32>
    %c0_1 = arith.constant 0 : index
    %c0_2 = arith.constant 0 : index
    %1 = vector.load %arg2[%c0_1, %c0_2] : memref<24x16xf32, #tpu.memory_space<vmem>>, vector<24x16xf32>
    %cst = arith.constant dense<0.000000e+00> : vector<256x16xf32>
    %2 = tpu.matmul %0, %1, %cst {dimension_numbers = #tpu.dot_dimension_numbers<[1], [0], [0], [1], [0, 0, 1, 1], [], []>} : vector<256x24xf32>, vector<24x16xf32>, vector<256x16xf32> -> vector<256x16xf32>
    %c0_3 = arith.constant 0 : index
    %c0_4 = arith.constant 0 : index
    %3 = vector.load %arg3[%c0_3, %c0_4] : memref<1x16xf32, #tpu.memory_space<vmem>>, vector<1x16xf32>
    %4 = vector.broadcast %3 : vector<1x16xf32> to vector<256x16xf32>
    %5 = arith.addf %2, %4 : vector<256x16xf32>
    %cst_5 = arith.constant 0.000000e+00 : f32
    %6 = vector.broadcast %cst_5 : f32 to vector<256x16xf32>
    %7 = arith.maximumf %5, %6 : vector<256x16xf32>
    %8 = vector.extract_strided_slice %7 {offsets = [0, 0], sizes = [16, 16], strides = [1, 1]} : vector<256x16xf32> to vector<16x16xf32>
    %9 = vector.extract_strided_slice %7 {offsets = [16, 0], sizes = [16, 16], strides = [1, 1]} : vector<256x16xf32> to vector<16x16xf32>
    %10 = vector.extract_strided_slice %7 {offsets = [32, 0], sizes = [16, 16], strides = [1, 1]} : vector<256x16xf32> to vector<16x16xf32>
    %11 = vector.extract_strided_slice %7 {offsets = [48, 0], sizes = [16, 16], strides = [1, 1]} : vector<256x16xf32> to vector<16x16xf32>
    %12 = vector.extract_strided_slice %7 {offsets = [64, 0], sizes = [16, 16], strides = [1, 1]} : vector<256x16xf32> to vector<16x16xf32>
    %13 = vector.extract_strided_slice %7 {offsets = [80, 0], sizes = [16, 16], strides = [1, 1]} : vector<256x16xf32> to vector<16x16xf32>
    %14 = vector.extract_strided_slice %7 {offsets = [96, 0], sizes = [16, 16], strides = [1, 1]} : vector<256x16xf32> to vector<16x16xf32>
    %15 = vector.extract_strided_slice %7 {offsets = [112, 0], sizes = [16, 16], strides = [1, 1]} : vector<256x16xf32> to vector<16x16xf32>
    %16 = vector.extract_strided_slice %7 {offsets = [128, 0], sizes = [16, 16], strides = [1, 1]} : vector<256x16xf32> to vector<16x16xf32>
    %17 = vector.extract_strided_slice %7 {offsets = [144, 0], sizes = [16, 16], strides = [1, 1]} : vector<256x16xf32> to vector<16x16xf32>
    %18 = vector.extract_strided_slice %7 {offsets = [160, 0], sizes = [16, 16], strides = [1, 1]} : vector<256x16xf32> to vector<16x16xf32>
    %19 = vector.extract_strided_slice %7 {offsets = [176, 0], sizes = [16, 16], strides = [1, 1]} : vector<256x16xf32> to vector<16x16xf32>
    %20 = vector.extract_strided_slice %7 {offsets = [192, 0], sizes = [16, 16], strides = [1, 1]} : vector<256x16xf32> to vector<16x16xf32>
    %21 = vector.extract_strided_slice %7 {offsets = [208, 0], sizes = [16, 16], strides = [1, 1]} : vector<256x16xf32> to vector<16x16xf32>
    %22 = vector.extract_strided_slice %7 {offsets = [224, 0], sizes = [16, 16], strides = [1, 1]} : vector<256x16xf32> to vector<16x16xf32>
    %23 = vector.extract_strided_slice %7 {offsets = [240, 0], sizes = [16, 16], strides = [1, 1]} : vector<256x16xf32> to vector<16x16xf32>
    %24 = arith.maximumf %8, %9 : vector<16x16xf32>
    %25 = arith.maximumf %10, %11 : vector<16x16xf32>
    %26 = arith.maximumf %12, %13 : vector<16x16xf32>
    %27 = arith.maximumf %14, %15 : vector<16x16xf32>
    %28 = arith.maximumf %16, %17 : vector<16x16xf32>
    %29 = arith.maximumf %18, %19 : vector<16x16xf32>
    %30 = arith.maximumf %20, %21 : vector<16x16xf32>
    %31 = arith.maximumf %22, %23 : vector<16x16xf32>
    %32 = arith.maximumf %24, %25 : vector<16x16xf32>
    %33 = arith.maximumf %26, %27 : vector<16x16xf32>
    %34 = arith.maximumf %28, %29 : vector<16x16xf32>
    %35 = arith.maximumf %30, %31 : vector<16x16xf32>
    %36 = arith.maximumf %32, %33 : vector<16x16xf32>
    %37 = arith.maximumf %34, %35 : vector<16x16xf32>
    %38 = arith.maximumf %36, %37 : vector<16x16xf32>
    %c0_6 = arith.constant 0 : index
    %c0_7 = arith.constant 0 : index
    %39 = vector.load %arg1[%c0_6, %c0_7] : memref<16x32xf32, #tpu.memory_space<vmem>>, vector<16x32xf32>
    %c0_8 = arith.constant 0 : index
    %c0_9 = arith.constant 0 : index
    %40 = vector.load %arg4[%c0_8, %c0_9] : memref<48x512xf32, #tpu.memory_space<vmem>>, vector<32x512xf32>
    %cst_10 = arith.constant dense<0.000000e+00> : vector<16x512xf32>
    %41 = tpu.matmul %39, %40, %cst_10 {dimension_numbers = #tpu.dot_dimension_numbers<[1], [0], [0], [1], [0, 0, 1, 1], [], []>} : vector<16x32xf32>, vector<32x512xf32>, vector<16x512xf32> -> vector<16x512xf32>
    %c32 = arith.constant 32 : index
    %c0_11 = arith.constant 0 : index
    %42 = vector.load %arg4[%c32, %c0_11] : memref<48x512xf32, #tpu.memory_space<vmem>>, vector<16x512xf32>
    %cst_12 = arith.constant dense<0.000000e+00> : vector<16x512xf32>
    %43 = tpu.matmul %38, %42, %cst_12 {dimension_numbers = #tpu.dot_dimension_numbers<[1], [0], [0], [1], [0, 0, 1, 1], [], []>} : vector<16x16xf32>, vector<16x512xf32>, vector<16x512xf32> -> vector<16x512xf32>
    %44 = arith.addf %41, %43 : vector<16x512xf32>
    %c0_13 = arith.constant 0 : index
    %c0_14 = arith.constant 0 : index
    %45 = vector.load %arg6[%c0_13, %c0_14] : memref<1x512xf32, #tpu.memory_space<vmem>>, vector<1x512xf32>
    %46 = vector.broadcast %45 : vector<1x512xf32> to vector<16x512xf32>
    %47 = arith.addf %44, %46 : vector<16x512xf32>
    %48 = tpu.iota {dimensions = array<i32: 1>} : vector<8x512xi32>
    %c64_i32 = arith.constant 64 : i32
    %49 = vector.broadcast %c64_i32 : i32 to vector<8x512xi32>
    %50 = arith.andi %48, %49 : vector<8x512xi32>
    %c0_i32 = arith.constant 0 : i32
    %51 = vector.broadcast %c0_i32 : i32 to vector<8x512xi32>
    %52 = arith.cmpi eq, %50, %51 : vector<8x512xi32>
    %53 = vector.extract_strided_slice %47 {offsets = [0, 0], sizes = [8, 512], strides = [1, 1]} : vector<16x512xf32> to vector<8x512xf32>
    %54 = vector.extract_strided_slice %47 {offsets = [8, 0], sizes = [8, 512], strides = [1, 1]} : vector<16x512xf32> to vector<8x512xf32>
    %55 = arith.select %52, %53, %54 : vector<8x512xi1>, vector<8x512xf32>
    %56 = vector.extract_strided_slice %47 {offsets = [8, 0], sizes = [8, 512], strides = [1, 1]} : vector<16x512xf32> to vector<8x512xf32>
    %57 = vector.extract_strided_slice %47 {offsets = [0, 0], sizes = [8, 512], strides = [1, 1]} : vector<16x512xf32> to vector<8x512xf32>
    %58 = arith.select %52, %56, %57 : vector<8x512xi1>, vector<8x512xf32>
    %c0_15 = arith.constant 0 : index
    %c0_16 = arith.constant 0 : index
    %59 = vector.load %arg5[%c0_15, %c0_16] : memref<128x512xf32, #tpu.memory_space<vmem>>, vector<128x512xf32>
    %cst_17 = arith.constant 0.000000e+00 : f32
    %60 = vector.broadcast %cst_17 : f32 to vector<8x128xf32>
    %cst_18 = arith.constant 0.000000e+00 : f32
    %61 = vector.broadcast %cst_18 : f32 to vector<8x128xf32>
    %cst_19 = arith.constant dense<0.000000e+00> : vector<8x512xf32>
    %62 = tpu.matmul %60, %59, %cst_19 {dimension_numbers = #tpu.dot_dimension_numbers<[1], [0], [0], [1], [0, 0, 1, 1], [], []>} : vector<8x128xf32>, vector<128x512xf32>, vector<8x512xf32> -> vector<8x512xf32>
    %63 = arith.addf %55, %62 : vector<8x512xf32>
    %64 = vector.extract_strided_slice %63 {offsets = [0, 0], sizes = [8, 384], strides = [1, 1]} : vector<8x512xf32> to vector<8x384xf32>
    %65 = arith.negf %64 : vector<8x384xf32>
    %66 = math.exp %65 : vector<8x384xf32>
    %cst_20 = arith.constant 1.000000e+00 : f32
    %67 = vector.broadcast %cst_20 : f32 to vector<8x384xf32>
    %68 = arith.addf %67, %66 : vector<8x384xf32>
    %69 = arith.divf %67, %68 : vector<8x384xf32>
    %70 = vector.extract_strided_slice %63 {offsets = [0, 384], sizes = [8, 128], strides = [1, 1]} : vector<8x512xf32> to vector<8x128xf32>
    %71 = math.tanh %70 : vector<8x128xf32>
    %72 = vector.extract_strided_slice %69 {offsets = [0, 0], sizes = [8, 128], strides = [1, 1]} : vector<8x384xf32> to vector<8x128xf32>
    %73 = vector.extract_strided_slice %69 {offsets = [0, 128], sizes = [8, 128], strides = [1, 1]} : vector<8x384xf32> to vector<8x128xf32>
    %74 = vector.extract_strided_slice %69 {offsets = [0, 256], sizes = [8, 128], strides = [1, 1]} : vector<8x384xf32> to vector<8x128xf32>
    %75 = arith.mulf %73, %61 : vector<8x128xf32>
    %76 = arith.mulf %72, %71 : vector<8x128xf32>
    %77 = arith.addf %75, %76 : vector<8x128xf32>
    %78 = math.tanh %77 : vector<8x128xf32>
    %79 = arith.mulf %74, %78 : vector<8x128xf32>
    %cst_21 = arith.constant dense<0.000000e+00> : vector<8x512xf32>
    %80 = tpu.matmul %79, %59, %cst_21 {dimension_numbers = #tpu.dot_dimension_numbers<[1], [0], [0], [1], [0, 0, 1, 1], [], []>} : vector<8x128xf32>, vector<128x512xf32>, vector<8x512xf32> -> vector<8x512xf32>
    %81 = arith.addf %58, %80 : vector<8x512xf32>
    %82 = vector.extract_strided_slice %81 {offsets = [0, 0], sizes = [8, 384], strides = [1, 1]} : vector<8x512xf32> to vector<8x384xf32>
    %83 = arith.negf %82 : vector<8x384xf32>
    %84 = math.exp %83 : vector<8x384xf32>
    %cst_22 = arith.constant 1.000000e+00 : f32
    %85 = vector.broadcast %cst_22 : f32 to vector<8x384xf32>
    %86 = arith.addf %85, %84 : vector<8x384xf32>
    %87 = arith.divf %85, %86 : vector<8x384xf32>
    %88 = vector.extract_strided_slice %81 {offsets = [0, 384], sizes = [8, 128], strides = [1, 1]} : vector<8x512xf32> to vector<8x128xf32>
    %89 = math.tanh %88 : vector<8x128xf32>
    %90 = vector.extract_strided_slice %87 {offsets = [0, 0], sizes = [8, 128], strides = [1, 1]} : vector<8x384xf32> to vector<8x128xf32>
    %91 = vector.extract_strided_slice %87 {offsets = [0, 128], sizes = [8, 128], strides = [1, 1]} : vector<8x384xf32> to vector<8x128xf32>
    %92 = vector.extract_strided_slice %87 {offsets = [0, 256], sizes = [8, 128], strides = [1, 1]} : vector<8x384xf32> to vector<8x128xf32>
    %93 = arith.mulf %91, %77 : vector<8x128xf32>
    %94 = arith.mulf %90, %89 : vector<8x128xf32>
    %95 = arith.addf %93, %94 : vector<8x128xf32>
    %96 = math.tanh %95 : vector<8x128xf32>
    %97 = arith.mulf %92, %96 : vector<8x128xf32>
    %98 = tpu.iota {dimensions = array<i32: 1>} : vector<8x128xi32>
    %c64_i32_23 = arith.constant 64 : i32
    %99 = vector.broadcast %c64_i32_23 : i32 to vector<8x128xi32>
    %100 = arith.cmpi slt, %98, %99 : vector<8x128xi32>
    %101 = arith.select %100, %79, %97 : vector<8x128xi1>, vector<8x128xf32>
    %102 = arith.select %100, %97, %79 : vector<8x128xi1>, vector<8x128xf32>
    %103 = tpu.concatenate %101, %102 in 0 : vector<8x128xf32>, vector<8x128xf32> -> vector<16x128xf32>
    %c0_24 = arith.constant 0 : index
    %c0_25 = arith.constant 0 : index
    %104 = vector.load %arg7[%c0_24, %c0_25] : memref<128x128xf32, #tpu.memory_space<vmem>>, vector<128x128xf32>
    %cst_26 = arith.constant dense<0.000000e+00> : vector<16x128xf32>
    %105 = tpu.matmul %103, %104, %cst_26 {dimension_numbers = #tpu.dot_dimension_numbers<[1], [0], [0], [1], [0, 0, 1, 1], [], []>} : vector<16x128xf32>, vector<128x128xf32>, vector<16x128xf32> -> vector<16x128xf32>
    %c0_27 = arith.constant 0 : index
    %c0_28 = arith.constant 0 : index
    %106 = vector.load %arg8[%c0_27, %c0_28] : memref<1x128xf32, #tpu.memory_space<vmem>>, vector<1x128xf32>
    %107 = vector.broadcast %106 : vector<1x128xf32> to vector<16x128xf32>
    %108 = arith.addf %105, %107 : vector<16x128xf32>
    %cst_29 = arith.constant dense<0xFF800000> : vector<16xf32>
    %109 = vector.multi_reduction <maximumf>, %108, %cst_29 [1] : vector<16x128xf32> to vector<16xf32>
    %110 = vector.shape_cast %109 : vector<16xf32> to vector<16x1xf32>
    %111 = vector.broadcast %110 : vector<16x1xf32> to vector<16x128xf32>
    %112 = arith.subf %108, %111 : vector<16x128xf32>
    %113 = math.exp %112 : vector<16x128xf32>
    %cst_30 = arith.constant dense<0.000000e+00> : vector<16xf32>
    %114 = vector.multi_reduction <add>, %113, %cst_30 [1] : vector<16x128xf32> to vector<16xf32>
    %115 = vector.shape_cast %114 : vector<16xf32> to vector<16x1xf32>
    %116 = math.log %115 : vector<16x1xf32>
    %117 = vector.broadcast %116 : vector<16x1xf32> to vector<16x128xf32>
    %118 = arith.subf %112, %117 : vector<16x128xf32>
    %c0_31 = arith.constant 0 : index
    %c0_32 = arith.constant 0 : index
    %119 = vector.load %arg9[%c0_31, %c0_32] : memref<16x128xf32, #tpu.memory_space<vmem>>, vector<16x128xf32>
    tpu.vector_store %arg9[%c0_31, %c0_32], %118 {strides = array<i32>} : memref<16x128xf32, #tpu.memory_space<vmem>>, vector<16x128xf32>,
    return
  }
}

</mosaic_0001>

<bundles_post_ra>
// kernel: pos_tag_net_forward.1
= control target key start
LH: loop header
LB: loop body
LE: loop exit
PB: predicated region body
PF: predicated region fallthrough
CT: control target
= control target key end

     0   :  { %vm74_vm0 = vcmask 195584   ;;  %v1619_v39 = vmov 0.0   ;;  %vm484_vm1 = vcmask 130048   ;;  %vm645_vm2 = vcmask 261120   ;;  %s2363_s2 = inlined_call_operand.vmem [shape: f32[24,16], index: 2, kind: input, shape index: {}]   ;;  %s2364_s0 = inlined_call_operand.vmem [shape: f32[256,24], index: 0, kind: input, shape index: {}]   ;;  %s2365_s4 = inlined_call_operand.vmem [shape: f32[48,512], index: 4, kind: input, shape index: {}]   ;;  %s2366_s5 = inlined_call_operand.vmem [shape: f32[128,512], index: 5, kind: input, shape index: {}]   ;;  %s2367_s3 = inlined_call_operand.vmem [shape: f32[1,16], index: 3, kind: input, shape index: {}]   ;;  %s2368_s1 = inlined_call_operand.vmem [shape: f32[16,32], index: 1, kind: input, shape index: {}]   ;;  %s2369_s6 = inlined_call_operand.vmem [shape: f32[1,512], index: 6, kind: input, shape index: {}]   ;;  %s2370_s7 = inlined_call_operand.vmem [shape: f32[128,128], index: 7, kind: input, shape index: {}]   ;;  %s2371_s8 = inlined_call_operand.vmem [shape: f32[1,128], index: 8, kind: input, shape index: {}]   ;;  %s2372_s9 = inlined_call_operand.vmem [shape: f32[16,128], index: 9, kind: output, shape index: {}]  }
   0x1   :  { %v66_v0 = vld [vmem:[%s2363_s2 + $0x10] sm:$0xff]  ;;  %v65_v1 = vld [vmem:[%s2363_s2 + $0x8] sm:$0xff]  ;;  %v32_v2 = vld [vmem:[%s2364_s0] sm:$0xff]  ;;  %555 = vmatprep.mubr.f32.mxu1 %v1619_v39 }
   0x2   :  { %1489 = vmatprep.subr.mxu0 %v66_v0  ;;  %v64_v3 = vld [vmem:[%s2363_s2] sm:$0xff]  ;;  %1495 = vmatprep.mubr.msk.f32.mxu0 %vm74_vm0, %v32_v2  ;;  %v33_v4 = vld [vmem:[%s2364_s0 + $0x8] sm:$0xff]  ;;  %v34_v5 = vld [vmem:[%s2364_s0 + $0x10] sm:$0xff] }
   0x3   :  { %1490 = vmatpush3.msra.mxu0 %v66_v0  ;;  %v35_v6 = vld [vmem:[%s2364_s0 + $0x18] sm:$0xff]  ;;  %v36_v7 = vld [vmem:[%s2364_s0 + $0x20] sm:$0xff]  ;;  %v37_v8 = vld [vmem:[%s2364_s0 + $0x28] sm:$0xff] }
   0x4   :  { %1491 = vmatprep.subr.mxu0 %v65_v1  ;;  %v38_v9 = vld [vmem:[%s2364_s0 + $0x30] sm:$0xff]  ;;  %v39_v10 = vld [vmem:[%s2364_s0 + $0x38] sm:$0xff]  ;;  %v40_v11 = vld [vmem:[%s2364_s0 + $0x40] sm:$0xff] }
   0x5   :  { %1492 = vmatpush3.msra.mxu0 %v65_v1  ;;  %v41_v12 = vld [vmem:[%s2364_s0 + $0x48] sm:$0xff]  ;;  %v42_v13 = vld [vmem:[%s2364_s0 + $0x50] sm:$0xff]  ;;  %v43_v14 = vld [vmem:[%s2364_s0 + $0x58] sm:$0xff] }
   0x6   :  { %1493 = vmatprep.subr.mxu0 %v64_v3  ;;  %v44_v15 = vld [vmem:[%s2364_s0 + $0x60] sm:$0xff]  ;;  %v45_v16 = vld [vmem:[%s2364_s0 + $0x68] sm:$0xff]  ;;  %v46_v17 = vld [vmem:[%s2364_s0 + $0x70] sm:$0xff] }
   0x7   :  { %1494 = vmatpush3.msra.mxu0 %v64_v3  ;;  %v47_v18 = vld [vmem:[%s2364_s0 + $0x78] sm:$0xff]  ;;  %v48_v19 = vld [vmem:[%s2364_s0 + $0x80] sm:$0xff]  ;;  %v49_v20 = vld [vmem:[%s2364_s0 + $0x88] sm:$0xff] }
   0x8   :  { %1496 = vmatmul.mubr.msk.f32.vlgmr.msra.gmra.mxu0 %vm74_vm0, %v33_v4  ;;  %v50_v21 = vld [vmem:[%s2364_s0 + $0x90] sm:$0xff]  ;;  %v51_v22 = vld [vmem:[%s2364_s0 + $0x98] sm:$0xff]  ;;  %v52_v23 = vld [vmem:[%s2364_s0 + $0xa0] sm:$0xff] }
   0x9   :  { %1498 = vmatprep.mubr.msk.f32.mxu0 %vm74_vm0, %v34_v5  ;;  %v53_v24 = vld [vmem:[%s2364_s0 + $0xa8] sm:$0xff]  ;;  %v54_v25 = vld [vmem:[%s2364_s0 + $0xb0] sm:$0xff]  ;;  %v55_v26 = vld [vmem:[%s2364_s0 + $0xb8] sm:$0xff] }
   0xa   :  { %v56_v27 = vld [vmem:[%s2364_s0 + $0xc0] sm:$0xff]  ;;  %v57_v28 = vld [vmem:[%s2364_s0 + $0xc8] sm:$0xff]  ;;  %v58_v29 = vld [vmem:[%s2364_s0 + $0xd0] sm:$0xff] }
   0xb   :  { %v59_v30 = vld [vmem:[%s2364_s0 + $0xd8] sm:$0xff]  ;;  %v60_v31 = vld [vmem:[%s2364_s0 + $0xe0] sm:$0xff]  ;;  %v61_v32 = vld [vmem:[%s2364_s0 + $0xe8] sm:$0xff] }
   0xc   :  { %1499 = vmatmul.mubr.msk.f32.gmra.mxu0 %vm74_vm0, %v35_v6  ;;  %v62_v33 = vld [vmem:[%s2364_s0 + $0xf0] sm:$0xff]  ;;  %v63_v34 = vld [vmem:[%s2364_s0 + $0xf8] sm:$0xff]  ;;  %v481_v35 = vld [vmem:[%s2365_s4 + $0xa8] sm:$0xff] }
   0xd   :  { %1501 = vmatprep.mubr.msk.f32.mxu0 %vm74_vm0, %v36_v7  ;;  %519 = vmatprep.subr.mxu1 %v481_v35  ;;  %v480_v36 = vld [vmem:[%s2365_s4 + $0xa0] sm:$0xff]  ;;  %v477_v37 = vld [vmem:[%s2365_s4 + $0x88] sm:$0xff]  ;;  %v483_v40 = vld [vmem:[%s2365_s4 + $0xb8] sm:$0xff] }
   0xe   :  { %v476_v38 = vld [vmem:[%s2365_s4 + $0x80] sm:$0xff]  ;;  %520 = vmatpush1.msra.mxu1 %v480_v36  ;;  %v1827_v41 = vld [vmem:[%s2366_s5 + $0x1f8] sm:$0xff]  ;;  %v1833_v42 = vld [vmem:[%s2366_s5 + $0x1f0] sm:$0xff] }
   0xf   :  { %521 = vmatprep.subr.mxu1 %v477_v37  ;;  %992 = vmatprep.subr.mxu0 %v1827_v41  ;;  %v1839_v43 = vld [vmem:[%s2366_s5 + $0x1d8] sm:$0xff]  ;;  %v915_v44 = vld [vmem:[%s2366_s5 + $0x1d0] sm:$0xff] }
  0x10   :  { %1502 = vmatmul.mubr.msk.f32.gmra.mxu0 %vm74_vm0, %v37_v8  ;;  %522 = vmatpush1.msra.mxu1 %v476_v38  ;;  %v912_v45 = vld [vmem:[%s2366_s5 + $0x1b8] sm:$0xff]  ;;  %v911_v46 = vld [vmem:[%s2366_s5 + $0x1b0] sm:$0xff] }
  0x11   :  { %1504 = vmatprep.mubr.msk.f32.mxu0 %vm74_vm0, %v38_v9  ;;  %596 = vmatprep.subr.mxu1 %v483_v40  ;;  %v908_v47 = vld [vmem:[%s2366_s5 + $0x198] sm:$0xff]  ;;  %v907_v48 = vld [vmem:[%s2366_s5 + $0x190] sm:$0xff] }
  0x12   :  { %993 = vmatpush1.msra.mxu0 %v1833_v42  ;;  %v904_v49 = vld [vmem:[%s2366_s5 + $0x178] sm:$0xff]  ;;  %v903_v50 = vld [vmem:[%s2366_s5 + $0x170] sm:$0xff] }
  0x13   :  { %994 = vmatprep.subr.mxu0 %v1839_v43  ;;  %v900_v51 = vld [vmem:[%s2366_s5 + $0x158] sm:$0xff]  ;;  %v899_v52 = vld [vmem:[%s2366_s5 + $0x150] sm:$0xff] }
  0x14   :  { %1505 = vmatmul.mubr.msk.f32.gmra.mxu0 %vm74_vm0, %v39_v10  ;;  %v896_v53 = vld [vmem:[%s2366_s5 + $0x138] sm:$0xff]  ;;  %v895_v54 = vld [vmem:[%s2366_s5 + $0x130] sm:$0xff] }
  0x15   :  { %1507 = vmatprep.mubr.msk.f32.mxu0 %vm74_vm0, %v40_v11  ;;  %995 = vmatpush1.msra.mxu0 %v915_v44  ;;  %v892_v55 = vld [vmem:[%s2366_s5 + $0x118] sm:$0xff]  ;;  %v891_v56 = vld [vmem:[%s2366_s5 + $0x110] sm:$0xff] }
  0x16   :  { %996 = vmatprep.subr.mxu0 %v912_v45  ;;  %v888_v57 = vld [vmem:[%s2366_s5 + $0xf8] sm:$0xff]  ;;  %v887_v58 = vld [vmem:[%s2366_s5 + $0xf0] sm:$0xff] }
  0x17   :  { %997 = vmatpush1.msra.mxu0 %v911_v46  ;;  %v884_v59 = vld [vmem:[%s2366_s5 + $0xd8] sm:$0xff]  ;;  %v883_v60 = vld [vmem:[%s2366_s5 + $0xd0] sm:$0xff] }
  0x18   :  { %1508 = vmatmul.mubr.msk.f32.gmra.mxu0 %vm74_vm0, %v41_v12  ;;  %998 = vmatprep.subr.mxu0 %v908_v47  ;;  %v880_v61 = vld [vmem:[%s2366_s5 + $0xb8] sm:$0xff]  ;;  %v879_v62 = vld [vmem:[%s2366_s5 + $0xb0] sm:$0xff] }
  0x19   :  { %1510 = vmatprep.mubr.msk.f32.mxu0 %vm74_vm0, %v42_v13  ;;  %999 = vmatpush1.msra.mxu0 %v907_v48  ;;  %v876_v63 = vld [vmem:[%s2366_s5 + $0x98] sm:$0xff]  ;;  %v875_v0 = vld [vmem:[%s2366_s5 + $0x90] sm:$0xff] }
  0x1a   :  { %1000 = vmatprep.subr.mxu0 %v904_v49  ;;  %v872_v1 = vld [vmem:[%s2366_s5 + $0x78] sm:$0xff]  ;;  %v871_v2 = vld [vmem:[%s2366_s5 + $0x70] sm:$0xff] }
  0x1b   :  { %1001 = vmatpush1.msra.mxu0 %v903_v50  ;;  %v868_v3 = vld [vmem:[%s2366_s5 + $0x58] sm:$0xff]  ;;  %v867_v4 = vld [vmem:[%s2366_s5 + $0x50] sm:$0xff] }
  0x1c   :  { %1511 = vmatmul.mubr.msk.f32.gmra.mxu0 %vm74_vm0, %v43_v14  ;;  %1002 = vmatprep.subr.mxu0 %v900_v51  ;;  %v864_v5 = vld [vmem:[%s2366_s5 + $0x38] sm:$0xff]  ;;  %v863_v6 = vld [vmem:[%s2366_s5 + $0x30] sm:$0xff] }
  0x1d   :  { %1513 = vmatprep.mubr.msk.f32.mxu0 %vm74_vm0, %v44_v15  ;;  %1003 = vmatpush1.msra.mxu0 %v899_v52  ;;  %v860_v7 = vld [vmem:[%s2366_s5 + $0x18] sm:$0xff]  ;;  %v859_v8 = vld [vmem:[%s2366_s5 + $0x10] sm:$0xff] }
  0x1e   :  { %1004 = vmatprep.subr.mxu0 %v896_v53 }
  0x1f   :  { %1005 = vmatpush1.msra.mxu0 %v895_v54 }
  0x20   :  { %1514 = vmatmul.mubr.msk.f32.gmra.mxu0 %vm74_vm0, %v45_v16  ;;  %1006 = vmatprep.subr.mxu0 %v892_v55 }
  0x21   :  { %1516 = vmatprep.mubr.msk.f32.mxu0 %vm74_vm0, %v46_v17  ;;  %1007 = vmatpush1.msra.mxu0 %v891_v56 }
  0x22   :  { %1008 = vmatprep.subr.mxu0 %v888_v57 }
  0x23   :  { %1009 = vmatpush1.msra.mxu0 %v887_v58 }
  0x24   :  { %1517 = vmatmul.mubr.msk.f32.gmra.mxu0 %vm74_vm0, %v47_v18  ;;  %1010 = vmatprep.subr.mxu0 %v884_v59 }
  0x25   :  { %1519 = vmatprep.mubr.msk.f32.mxu0 %vm74_vm0, %v48_v19  ;;  %1011 = vmatpush1.msra.mxu0 %v883_v60 }
  0x26   :  { %1012 = vmatprep.subr.mxu0 %v880_v61 }
  0x27   :  { %1013 = vmatpush1.msra.mxu0 %v879_v62 }
  0x28   :  { %1520 = vmatmul.mubr.msk.f32.gmra.mxu0 %vm74_vm0, %v49_v20  ;;  %1014 = vmatprep.subr.mxu0 %v876_v63 }
  0x29   :  { %1522 = vmatprep.mubr.msk.f32.mxu0 %vm74_vm0, %v50_v21  ;;  %1015 = vmatpush1.msra.mxu0 %v875_v0 }
  0x2a   :  { %1016 = vmatprep.subr.mxu0 %v872_v1 }
  0x2b   :  { %1017 = vmatpush1.msra.mxu0 %v871_v2 }
  0x2c   :  { %1523 = vmatmul.mubr.msk.f32.gmra.mxu0 %vm74_vm0, %v51_v22  ;;  %1018 = vmatprep.subr.mxu0 %v868_v3 }
  0x2d   :  { %1525 = vmatprep.mubr.msk.f32.mxu0 %vm74_vm0, %v52_v23  ;;  %1019 = vmatpush1.msra.mxu0 %v867_v4 }
  0x2e   :  { %1020 = vmatprep.subr.mxu0 %v864_v5 }
  0x2f   :  { %1021 = vmatpush1.msra.mxu0 %v863_v6 }
  0x30   :  { %1526 = vmatmul.mubr.msk.f32.gmra.mxu0 %vm74_vm0, %v53_v24  ;;  %1022 = vmatprep.subr.mxu0 %v860_v7 }
  0x31   :  { %1528 = vmatprep.mubr.msk.f32.mxu0 %vm74_vm0, %v54_v25  ;;  %1023 = vmatpush1.msra.mxu0 %v859_v8 }
  0x32   :  { %1162 = vmatprep.subr.mxu0 %v1827_v41 }
  0x34   :  { %1529 = vmatmul.mubr.msk.f32.gmra.mxu0 %vm74_vm0, %v55_v26 }
  0x35   :  { %1531 = vmatprep.mubr.msk.f32.mxu0 %vm74_vm0, %v56_v27 }
  0x38   :  { %1532 = vmatmul.mubr.msk.f32.gmra.mxu0 %vm74_vm0, %v57_v28 }
  0x39   :  { %1534 = vmatprep.mubr.msk.f32.mxu0 %vm74_vm0, %v58_v29 }
  0x3c   :  { %1535 = vmatmul.mubr.msk.f32.gmra.mxu0 %vm74_vm0, %v59_v30 }
  0x3d   :  { %1537 = vmatprep.mubr.msk.f32.mxu0 %vm74_vm0, %v60_v31 }
  0x40   :  { %1538 = vmatmul.mubr.msk.f32.gmra.mxu0 %vm74_vm0, %v61_v32  ;;  %v1937_v32 = vld [vmem:[%s2367_s3] ss:$0 sm:$0xff] }
  0x41   :  { %1540 = vmatprep.mubr.msk.f32.mxu0 %vm74_vm0, %v62_v33 }
  0x44   :  { %1541 = vmatmul.mubr.msk.f32.gmra.mxu0 %vm74_vm0, %v63_v34 }
  0x45   :  { %1056 = vmatprep.mubr.f32.mxu0 %v1619_v39 }
  0x48   :  { %1057 = vmatmul.mubr.f32.vlgmr.msra.gmra.mxu0 %v1619_v39 }
  0x49   :  { %1163 = vmatpush1.msra.mxu0 %v1833_v42  ;;  %1226 = vmatprep.mubr.f32.mxu0 %v1619_v39 }
  0x4a   :  { %1164 = vmatprep.subr.mxu0 %v1839_v43 }
  0x4b   :  { %1165 = vmatpush1.msra.mxu0 %v915_v44 }
  0x4c   :  { %1166 = vmatprep.subr.mxu0 %v912_v45 }
  0x4d   :  { %1167 = vmatpush1.msra.mxu0 %v911_v46 }
  0x4e   :  { %1168 = vmatprep.subr.mxu0 %v908_v47 }
  0x4f   :  { %1169 = vmatpush1.msra.mxu0 %v907_v48 }
  0x50   :  { %1170 = vmatprep.subr.mxu0 %v904_v49 }
  0x51   :  { %1171 = vmatpush1.msra.mxu0 %v903_v50 }
  0x52   :  { %1172 = vmatprep.subr.mxu0 %v900_v51 }
  0x53   :  { %1173 = vmatpush1.msra.mxu0 %v899_v52 }
  0x54   :  { %1174 = vmatprep.subr.mxu0 %v896_v53 }
  0x55   :  { %1175 = vmatpush1.msra.mxu0 %v895_v54 }
  0x56   :  { %1176 = vmatprep.subr.mxu0 %v892_v55 }
  0x57   :  { %1177 = vmatpush1.msra.mxu0 %v891_v56 }
  0x58   :  { %1178 = vmatprep.subr.mxu0 %v888_v57 }
  0x59   :  { %1179 = vmatpush1.msra.mxu0 %v887_v58 }
  0x5a   :  { %1180 = vmatprep.subr.mxu0 %v884_v59 }
  0x5b   :  { %1181 = vmatpush1.msra.mxu0 %v883_v60 }
  0x5c   :  { %1182 = vmatprep.subr.mxu0 %v880_v61 }
  0x5d   :  { %1183 = vmatpush1.msra.mxu0 %v879_v62 }
  0x5e   :  { %1184 = vmatprep.subr.mxu0 %v876_v63 }
  0x5f   :  { %1185 = vmatpush1.msra.mxu0 %v875_v0 }
  0x60   :  { %1186 = vmatprep.subr.mxu0 %v872_v1 }
  0x61   :  { %1187 = vmatpush1.msra.mxu0 %v871_v2 }
  0x62   :  { %1188 = vmatprep.subr.mxu0 %v868_v3 }
  0x63   :  { %1189 = vmatpush1.msra.mxu0 %v867_v4 }
  0x64   :  { %1190 = vmatprep.subr.mxu0 %v864_v5 }
  0x65   :  { %1191 = vmatpush1.msra.mxu0 %v863_v6 }
  0x66   :  { %1192 = vmatprep.subr.mxu0 %v860_v7 }
  0x67   :  { %1193 = vmatpush1.msra.mxu0 %v859_v8 }
  0xc8   :  { %v1497_v9 = vpop.f32.mrf.mxu0 }
  0xc9   :  { %v1965_v58 = vadd.f32 %v1497_v9, %v1937_v32 }
  0xca   :  { %v237_v10 = vpop.f32.mrf.mxu0 }
  0xcb   :  { %v238_v36 = vadd.f32 %v1937_v32, %v237_v10 }
  0xcc   :  { %v1500_v11 = vpop.f32.mrf.mxu0 }
  0xcd   :  { %v1945_v41 = vadd.f32 %v1500_v11, %v1937_v32  ;;  %v396_v49 = vmax.f32 %v238_v36, 0.0 }
  0xce   :  { %v247_v12 = vpop.f32.mrf.mxu0 }
  0xcf   :  { %v248_v33 = vadd.f32 %v1937_v32, %v247_v12  ;;  %v399_v59 = vmax.f32 %v1945_v41, 0.0  ;;  %v478_v41 = vld [vmem:[%s2365_s4 + $0x90] sm:$0xff] }
  0xd0   :  { %v1503_v13 = vpop.f32.mrf.mxu0 }
  0xd1   :  { %v398_v42 = vmax.f32 %v248_v33, 0.0  ;;  %v1949_v45 = vadd.f32 %v1503_v13, %v1937_v32 }
  0xd2   :  { %v257_v14 = vpop.f32.mrf.mxu0 }
  0xd3   :  { %v258_v40 = vadd.f32 %v1937_v32, %v257_v14  ;;  %v1968_v60 = vmax.f32 %v396_v49, %v398_v42  ;;  %v401_v63 = vmax.f32 %v1949_v45, 0.0 }
  0xd4   :  { %v1506_v15 = vpop.f32.mrf.mxu0 }
  0xd5   :  { %v1952_v46 = vadd.f32 %v1506_v15, %v1937_v32  ;;  %v400_v54 = vmax.f32 %v258_v40, 0.0 }
  0xd6   :  { %v267_v16 = vpop.f32.mrf.mxu0 }
  0xd7   :  { %v268_v35 = vadd.f32 %v1937_v32, %v267_v16  ;;  %v403_v0 = vmax.f32 %v1952_v46, 0.0 }
  0xd8   :  { %v1509_v17 = vpop.f32.mrf.mxu0 }
  0xd9   :  { %v402_v47 = vmax.f32 %v268_v35, 0.0  ;;  %v1956_v50 = vadd.f32 %v1509_v17, %v1937_v32 }
  0xda   :  { %v277_v18 = vpop.f32.mrf.mxu0 }
  0xdb   :  { %v278_v43 = vadd.f32 %v1937_v32, %v277_v18  ;;  %v1972_v1 = vmax.f32 %v400_v54, %v402_v47  ;;  %v405_v3 = vmax.f32 %v1956_v50, 0.0 }
  0xdc   :  { %v1512_v19 = vpop.f32.mrf.mxu0 }
  0xdd   :  { %v1959_v51 = vadd.f32 %v1512_v19, %v1937_v32  ;;  %v404_v61 = vmax.f32 %v278_v43, 0.0 }
  0xde   :  { %v287_v20 = vpop.f32.mrf.mxu0 }
  0xdf   :  { %v288_v37 = vadd.f32 %v1937_v32, %v287_v20  ;;  %v407_v4 = vmax.f32 %v1959_v51, 0.0 }
  0xe0   :  { %v1515_v21 = vpop.f32.mrf.mxu0 }
  0xe1   :  { %v406_v52 = vmax.f32 %v288_v37, 0.0  ;;  %v303_v55 = vadd.f32 %v1515_v21, %v1937_v32 }
  0xe2   :  { %v297_v22 = vpop.f32.mrf.mxu0 }
  0xe3   :  { %v298_v56 = vadd.f32 %v1937_v32, %v297_v22  ;;  %v432_v5 = vmax.f32 %v404_v61, %v406_v52  ;;  %v409_v8 = vmax.f32 %v303_v55, 0.0  ;;  %v397_v61 = vmax.f32 %v1965_v58, 0.0 }
  0xe4   :  { %v1518_v23 = vpop.f32.mrf.mxu0 }
  0xe5   :  { %v313_v57 = vadd.f32 %v1518_v23, %v1937_v32  ;;  %v408_v9 = vmax.f32 %v298_v56, 0.0 }
  0xe6   :  { %v307_v24 = vpop.f32.mrf.mxu0 }
  0xe7   :  { %v308_v48 = vadd.f32 %v1937_v32, %v307_v24  ;;  %v411_v10 = vmax.f32 %v313_v57, 0.0 }
  0xe8   :  { %v1521_v25 = vpop.f32.mrf.mxu0 }
  0xe9   :  { %v410_v2 = vmax.f32 %v308_v48, 0.0  ;;  %v323_v18 = vadd.f32 %v1521_v25, %v1937_v32  ;;  %v435_v50 = vmax.f32 %v409_v8, %v411_v10 }
  0xea   :  { %v317_v26 = vpop.f32.mrf.mxu0 }
  0xeb   :  { %v318_v11 = vadd.f32 %v1937_v32, %v317_v26  ;;  %v434_v17 = vmax.f32 %v408_v9, %v410_v2  ;;  %v413_v52 = vmax.f32 %v323_v18, 0.0  ;;  %v433_v2 = vmax.f32 %v405_v3, %v407_v4  ;;  %v472_v3 = vld [vmem:[%s2365_s4 + $0x60] sm:$0xff]  ;;  %v469_v4 = vld [vmem:[%s2365_s4 + $0x48] sm:$0xff] }
  0xec   :  { %v1524_v27 = vpop.f32.mrf.mxu0  ;;  %v464_v18 = vld [vmem:[%s2365_s4 + $0x20] sm:$0xff] }
  0xed   :  { %v333_v21 = vadd.f32 %v1524_v27, %v1937_v32  ;;  %v446_v51 = vmax.f32 %v432_v5, %v434_v17  ;;  %v429_v5 = vmax.f32 %v397_v61, %v399_v59  ;;  %v447_v8 = vmax.f32 %v433_v2, %v435_v50  ;;  %v473_v59 = vld [vmem:[%s2365_s4 + $0x68] sm:$0xff]  ;;  %v865_v2 = vld [vmem:[%s2366_s5 + $0x40] sm:$0xff] }
  0xee   :  { %v327_v28 = vpop.f32.mrf.mxu0  ;;  %v465_v17 = vld [vmem:[%s2365_s4 + $0x28] sm:$0xff] }
  0xef   :  { %v328_v12 = vadd.f32 %v1937_v32, %v327_v28  ;;  %v412_v28 = vmax.f32 %v318_v11, 0.0  ;;  %v415_v43 = vmax.f32 %v333_v21, 0.0  ;;  %v475_v21 = vld [vmem:[%s2365_s4 + $0x78] sm:$0xff]  ;;  %v886_v50 = vld [vmem:[%s2366_s5 + $0xe8] sm:$0xff] }
  0xf0   :  { %v1527_v29 = vpop.f32.mrf.mxu0  ;;  %v870_v61 = vld [vmem:[%s2366_s5 + $0x68] sm:$0xff] }
  0xf1   :  { %v343_v22 = vadd.f32 %v1527_v29, %v1937_v32  ;;  %v414_v25 = vmax.f32 %v328_v12, 0.0 }
  0xf2   :  { %v337_v30 = vpop.f32.mrf.mxu0 }
  0xf3   :  { %v338_v13 = vadd.f32 %v1937_v32, %v337_v30 }
  0xf4   :  { %v1530_v31 = vpop.f32.mrf.mxu0 }
  0xf5   :  { %v353_v14 = vadd.f32 %v1530_v31, %v1937_v32 }
  0xf6   :  { %v347_v34 = vpop.f32.mrf.mxu0 }
  0xf7   :  { %v348_v6 = vadd.f32 %v1937_v32, %v347_v34  ;;  %v416_v34 = vmax.f32 %v338_v13, 0.0  ;;  %v419_v35 = vmax.f32 %v353_v14, 0.0 }
  0xf8   :  { %v1533_v38 = vpop.f32.mrf.mxu0 }
  0xf9   :  { %v418_v23 = vmax.f32 %v348_v6, 0.0  ;;  %v363_v24 = vadd.f32 %v1533_v38, %v1937_v32  ;;  %v417_v38 = vmax.f32 %v343_v22, 0.0  ;;  %v437_v6 = vmax.f32 %v413_v52, %v415_v43  ;;  %v458_v22 = vld [vmem:[%s2368_s1] sm:$0xff]  ;;  %v902_v43 = vld [vmem:[%s2366_s5 + $0x168] sm:$0xff] }
  0xfa   :  { %v357_v44 = vpop.f32.mrf.mxu0  ;;  %v882_v52 = vld [vmem:[%s2366_s5 + $0xc8] sm:$0xff] }
  0xfb   :  { %v358_v30 = vadd.f32 %v1937_v32, %v357_v44  ;;  %v438_v45 = vmax.f32 %v416_v34, %v418_v23  ;;  %v421_v46 = vmax.f32 %v363_v24, 0.0  ;;  %v439_v54 = vmax.f32 %v417_v38, %v419_v35  ;;  %v474_v23 = vld [vmem:[%s2365_s4 + $0x70] sm:$0xff]  ;;  %v471_v24 = vld [vmem:[%s2365_s4 + $0x58] sm:$0xff]  ;;  %v2075_v34 = vld [vmem:[%s2366_s5 + $0x1e8] sm:$0xff] }
  0xfc   :  { %v1536_v53 = vpop.f32.mrf.mxu0  ;;  %v2080_v35 = vld [vmem:[%s2366_s5 + $0x1e0] sm:$0xff] }
  0xfd   :  { %v373_v15 = vadd.f32 %v1536_v53, %v1937_v32  ;;  %v420_v47 = vmax.f32 %v358_v30, 0.0  ;;  %v436_v53 = vmax.f32 %v412_v28, %v414_v25  ;;  %v449_v12 = vmax.f32 %v437_v6, %v439_v54  ;;  %v467_v28 = vld [vmem:[%s2365_s4 + $0x38] sm:$0xff]  ;;  %v459_v30 = vld [vmem:[%s2368_s1 + $0x8] sm:$0xff]  ;;  %v462_v25 = vld [vmem:[%s2365_s4 + $0x10] sm:$0xff] }
  0xfe   :  { %v367_v62 = vpop.f32.mrf.mxu0  ;;  %v901_v38 = vld [vmem:[%s2366_s5 + $0x160] sm:$0xff]  ;;  %v878_v54 = vld [vmem:[%s2366_s5 + $0xa8] sm:$0xff] }
  0xff   :  { %v368_v19 = vadd.f32 %v1937_v32, %v367_v62  ;;  %v423_v36 = vmax.f32 %v373_v15, 0.0  ;;  %v431_v62 = vmax.f32 %v401_v63, %v403_v0  ;;  %v479_v63 = vld [vmem:[%s2365_s4 + $0x98] sm:$0xff]  ;;  %v862_v6 = vld [vmem:[%s2366_s5 + $0x28] sm:$0xff] }
 0x100   :  { %v1539_v7 = vpop.f32.mrf.mxu0 }
 0x101   :  { %v383_v20 = vadd.f32 %v1539_v7, %v1937_v32  ;;  %v422_v40 = vmax.f32 %v368_v19, 0.0  ;;  %v441_v55 = vmax.f32 %v421_v46, %v423_v36  ;;  %v448_v7 = vmax.f32 %v436_v53, %v438_v45  ;;  %v461_v19 = vld [vmem:[%s2365_s4 + $0x8] sm:$0xff]  ;;  %v897_v46 = vld [vmem:[%s2366_s5 + $0x140] sm:$0xff] }
 0x102   :  { %v377_v16 = vpop.f32.mrf.mxu0  ;;  %v445_v14 = vmax.f32 %v429_v5, %v431_v62  ;;  %v2085_v36 = vld [vmem:[%s2366_s5 + $0x1c8] sm:$0xff]  ;;  %v881_v53 = vld [vmem:[%s2366_s5 + $0xc0] sm:$0xff] }
 0x103   :  { %v378_v31 = vadd.f32 %v1937_v32, %v377_v16  ;;  %v425_v27 = vmax.f32 %v383_v20, 0.0  ;;  %v440_v56 = vmax.f32 %v420_v47, %v422_v40  ;;  %v468_v16 = vld [vmem:[%s2365_s4 + $0x40] sm:$0xff]  ;;  %v2099_v40 = vld [vmem:[%s2366_s5 + $0x1a8] sm:$0xff] }
 0x104   :  { %v1542_v26 = vpop.f32.mrf.mxu0  ;;  %v453_v0 = vmax.f32 %v445_v14, %v447_v8  ;;  %v460_v20 = vld [vmem:[%s2365_s4] sm:$0xff]  ;;  %v898_v45 = vld [vmem:[%s2366_s5 + $0x148] sm:$0xff] }
 0x105   :  { %v393_v33 = vadd.f32 %v1542_v26, %v1937_v32  ;;  %v424_v44 = vmax.f32 %v378_v31, 0.0  ;;  %v470_v26 = vld [vmem:[%s2365_s4 + $0x50] sm:$0xff]  ;;  %v894_v47 = vld [vmem:[%s2366_s5 + $0x128] sm:$0xff]  ;;  %v869_v62 = vld [vmem:[%s2366_s5 + $0x60] sm:$0xff] }
 0x106   :  { %v387_v37 = vpop.f32.mrf.mxu0  ;;  %v466_v31 = vld [vmem:[%s2365_s4 + $0x30] sm:$0xff] }
 0x107   :  { %v427_v42 = vmax.f32 %v393_v33, 0.0  ;;  %v388_v29 = vadd.f32 %v1937_v32, %v387_v37  ;;  %v444_v32 = vmax.f32 %v1968_v60, %v1972_v1  ;;  %v482_v60 = vld [vmem:[%s2365_s4 + $0xb0] sm:$0xff]  ;;  %v463_v33 = vld [vmem:[%s2365_s4 + $0x18] sm:$0xff]  ;;  %v2092_v37 = vld [vmem:[%s2366_s5 + $0x1c0] sm:$0xff] }
 0x109   :  { %v443_v48 = vmax.f32 %v425_v27, %v427_v42  ;;  %v426_v49 = vmax.f32 %v388_v29, 0.0  ;;  %v452_v10 = vmax.f32 %v444_v32, %v446_v51  ;;  %v2105_v27 = vld [vmem:[%s2366_s5 + $0x1a0] sm:$0xff]  ;;  %v2111_v42 = vld [vmem:[%s2366_s5 + $0x188] sm:$0xff] }
 0x10a   :  { %v905_v29 = vld [vmem:[%s2366_s5 + $0x180] sm:$0xff]  ;;  %v866_v32 = vld [vmem:[%s2366_s5 + $0x48] sm:$0xff] }
 0x10b   :  { %v442_v57 = vmax.f32 %v424_v44, %v426_v49  ;;  %v451_v9 = vmax.f32 %v441_v55, %v443_v48  ;;  %v893_v44 = vld [vmem:[%s2366_s5 + $0x120] sm:$0xff]  ;;  %v890_v48 = vld [vmem:[%s2366_s5 + $0x108] sm:$0xff] }
 0x10c   :  { %v889_v49 = vld [vmem:[%s2366_s5 + $0x100] sm:$0xff] }
 0x10d   :  { %v450_v11 = vmax.f32 %v440_v56, %v442_v57  ;;  %v455_v15 = vmax.f32 %v449_v12, %v451_v9  ;;  %v885_v51 = vld [vmem:[%s2366_s5 + $0xe0] sm:$0xff]  ;;  %v874_v56 = vld [vmem:[%s2366_s5 + $0x88] sm:$0xff]  ;;  %v808_v12 = vlaneseq }
 0x10e   :  { %v877_v55 = vld [vmem:[%s2366_s5 + $0xa0] sm:$0xff]  ;;  %v858_v9 = vld [vmem:[%s2366_s5 + $0x8] sm:$0xff] }
 0x10f   :  { %v454_v13 = vmax.f32 %v448_v7, %v450_v11  ;;  %v457_v1 = vmax.f32 %v453_v0, %v455_v15  ;;  %v873_v57 = vld [vmem:[%s2366_s5 + $0x80] sm:$0xff]  ;;  %v809_v15 = vshrl.u32 %v808_v12, 7 }
 0x110   :  { %v861_v7 = vld [vmem:[%s2366_s5 + $0x20] sm:$0xff] }
 0x111   :  { %v456_v58 = vmax.f32 %v452_v10, %v454_v13  ;;  %v857_v11 = vld [vmem:[%s2366_s5] sm:$0xff]  ;;  %v810_v0 = vsub.s32 0, %v809_v15 }
 0x113   :  { %1421 = vmatmul.mubr.msk.f32.vlgmr.msra.gmra.mxu1 %vm484_vm1, %v456_v58 }
 0x114   :  { %597 = vmatpush1.msra.mxu1 %v482_v60  ;;  %561 = vmatprep.mubr.f32.mxu1 %v1619_v39  ;;  %v2202_v60 = vand.u32 127, %v808_v12  ;;  %v1058_v12 = vpop.f32.mrf.mxu0 }
 0x115   :  { %598 = vmatprep.subr.mxu1 %v479_v63 }
 0x116   :  { %599 = vmatpush1.msra.mxu1 %v478_v41  ;;  %vm1261_vm7 = vcmp.lt.s32.totalorder %v2202_v60, 64 }
 0x117   :  { %1422 = vmatmul.mubr.msk.f32.gmra.mxu1 %vm484_vm1, %v457_v1  ;;  %676 = vmatprep.subr.mxu1 %v473_v59  ;;  %v806_v59 = vld [vmem:[%s2369_s6] sm:$0xf] }
 0x118   :  { %632 = vmatprep.mubr.f32.mxu1 %v1619_v39 }
 0x11b   :  { %1423 = vmatmul.mubr.msk.f32.vlgmr.msra.gmra.mxu1 %vm484_vm1, %v456_v58 }
 0x11c   :  { %677 = vmatpush1.msra.mxu1 %v472_v3  ;;  %638 = vmatprep.mubr.f32.mxu1 %v1619_v39  ;;  %v814_v3 = vsub.s32 1, %v809_v15 }
 0x11d   :  { %678 = vmatprep.subr.mxu1 %v469_v4 }
 0x11e   :  { %679 = vmatpush1.msra.mxu1 %v468_v16  ;;  %v841_v16 = vand.u32 64, %v2202_v60 }
 0x11f   :  { %680 = vmatprep.subr.mxu1 %v465_v17  ;;  %1424 = vmatmul.mubr.msk.f32.gmra.mxu1 %vm484_vm1, %v457_v1  ;;  %v838_v1 = vadd.s32 128, %v2202_v60 }
 0x120   :  { %681 = vmatpush1.msra.mxu1 %v464_v18  ;;  %716 = vmatprep.mubr.f32.mxu1 %v1619_v39  ;;  %v811_v18 = vrot.slane %v806_v59, %v810_v0  ;;  %vm2210_vm3 = vcmp.eq.s32.totalorder %v841_v16, 0 }
 0x121   :  { %682 = vmatprep.subr.mxu1 %v461_v19 }
 0x122   :  { %683 = vmatpush1.msra.mxu1 %v460_v20  ;;  %v842_v20 = vand.u32 64, %v838_v1 }
 0x123   :  { %753 = vmatprep.subr.mxu1 %v475_v21  ;;  %1425 = vmatmul.mubr.msk.f32.vlgmr.msra.gmra.mxu1 %vm645_vm2, %v458_v22 }
 0x124   :  { %754 = vmatpush1.msra.mxu1 %v474_v23  ;;  %722 = vmatprep.mubr.f32.mxu1 %v1619_v39  ;;  %vm2219_vm4 = vcmp.eq.s32.totalorder %v842_v20, 0 }
 0x125   :  { %755 = vmatprep.subr.mxu1 %v471_v24 }
 0x126   :  { %756 = vmatpush1.msra.mxu1 %v470_v26  ;;  %v839_v26 = vadd.s32 256, %v2202_v60 }
 0x127   :  { %757 = vmatprep.subr.mxu1 %v467_v28  ;;  %1426 = vmatmul.mubr.msk.f32.gmra.mxu1 %vm645_vm2, %v459_v30 }
 0x128   :  { %758 = vmatpush1.msra.mxu1 %v466_v31  ;;  %793 = vmatprep.mubr.f32.mxu1 %v1619_v39 }
 0x129   :  { %759 = vmatprep.subr.mxu1 %v463_v33 }
 0x12a   :  { %760 = vmatpush1.msra.mxu1 %v462_v25  ;;  %v818_v25 = vsub.s32 2, %v809_v15 }
 0x12b   :  { %921 = vmatprep.subr.mxu1 %v2075_v34  ;;  %1427 = vmatmul.mubr.msk.f32.vlgmr.msra.gmra.mxu1 %vm645_vm2, %v458_v22  ;;  %v815_v22 = vrot.slane %v806_v59, %v814_v3 }
 0x12c   :  { %922 = vmatpush1.msra.mxu1 %v2080_v35  ;;  %799 = vmatprep.mubr.f32.mxu1 %v1619_v39 }
 0x12d   :  { %923 = vmatprep.subr.mxu1 %v2085_v36 }
 0x12e   :  { %924 = vmatpush1.msra.mxu1 %v2092_v37 }
 0x12f   :  { %925 = vmatprep.subr.mxu1 %v2099_v40  ;;  %1428 = vmatmul.mubr.msk.f32.gmra.mxu1 %vm645_vm2, %v459_v30 }
 0x130   :  { %926 = vmatpush1.msra.mxu1 %v2105_v27  ;;  %985 = vmatprep.mubr.f32.mxu1 %v1619_v39 }
 0x131   :  { %927 = vmatprep.subr.mxu1 %v2111_v42 }
 0x132   :  { %928 = vmatpush1.msra.mxu1 %v905_v29 }
 0x133   :  { %929 = vmatprep.subr.mxu1 %v902_v43 }
 0x134   :  { %930 = vmatpush1.msra.mxu1 %v901_v38 }
 0x135   :  { %931 = vmatprep.subr.mxu1 %v898_v45 }
 0x136   :  { %932 = vmatpush1.msra.mxu1 %v897_v46 }
 0x137   :  { %933 = vmatprep.subr.mxu1 %v894_v47 }
 0x138   :  { %934 = vmatpush1.msra.mxu1 %v893_v44 }
 0x139   :  { %935 = vmatprep.subr.mxu1 %v890_v48 }
 0x13a   :  { %936 = vmatpush1.msra.mxu1 %v889_v49 }
 0x13b   :  { %937 = vmatprep.subr.mxu1 %v886_v50 }
 0x13c   :  { %938 = vmatpush1.msra.mxu1 %v885_v51 }
 0x13d   :  { %939 = vmatprep.subr.mxu1 %v882_v52 }
 0x13e   :  { %940 = vmatpush1.msra.mxu1 %v881_v53 }
 0x13f   :  { %941 = vmatprep.subr.mxu1 %v878_v54 }
 0x140   :  { %942 = vmatpush1.msra.mxu1 %v877_v55 }
 0x141   :  { %943 = vmatprep.subr.mxu1 %v874_v56 }
 0x142   :  { %944 = vmatpush1.msra.mxu1 %v873_v57 }
 0x143   :  { %945 = vmatprep.subr.mxu1 %v870_v61 }
 0x144   :  { %946 = vmatpush1.msra.mxu1 %v869_v62 }
 0x145   :  { %947 = vmatprep.subr.mxu1 %v866_v32 }
 0x146   :  { %948 = vmatpush1.msra.mxu1 %v865_v2 }
 0x147   :  { %949 = vmatprep.subr.mxu1 %v862_v6 }
 0x148   :  { %950 = vmatpush1.msra.mxu1 %v861_v7 }
 0x149   :  { %951 = vmatprep.subr.mxu1 %v858_v9 }
 0x14a   :  { %952 = vmatpush1.msra.mxu1 %v857_v11 }
 0x14b   :  { %986 = vmatmul.mubr.f32.vlgmr.msra.gmra.mxu1 %v1619_v39  ;;  %1091 = vmatprep.subr.mxu1 %v2075_v34 }
 0x14c   :  { %1092 = vmatpush1.msra.mxu1 %v2080_v35  ;;  %1155 = vmatprep.mubr.f32.mxu1 %v1619_v39  ;;  %v840_v35 = vadd.s32 384, %v2202_v60 }
 0x14d   :  { %1093 = vmatprep.subr.mxu1 %v2085_v36 }
 0x14e   :  { %1094 = vmatpush1.msra.mxu1 %v2092_v37 }
 0x14f   :  { %1095 = vmatprep.subr.mxu1 %v2099_v40 }
 0x150   :  { %1096 = vmatpush1.msra.mxu1 %v2105_v27  ;;  %v822_v27 = vsub.s32 3, %v809_v15  ;;  %v1060_v15 = vpop.f32.mrf.mxu0 }
 0x151   :  { %1097 = vmatprep.subr.mxu1 %v2111_v42 }
 0x152   :  { %1098 = vmatpush1.msra.mxu1 %v905_v29 }
 0x153   :  { %1099 = vmatprep.subr.mxu1 %v902_v43  ;;  %v843_v43 = vand.u32 64, %v839_v26  ;;  %v1279_v26 = vld [vmem:[%s2370_s7 + $0x78] sm:$0xff] }
 0x154   :  { %1100 = vmatpush1.msra.mxu1 %v901_v38 }
 0x155   :  { %1101 = vmatprep.subr.mxu1 %v898_v45  ;;  %v819_v45 = vrot.slane %v806_v59, %v818_v25  ;;  %vm2235_vm5 = vcmp.eq.s32.totalorder %v843_v43, 0  ;;  %v1277_v25 = vld [vmem:[%s2370_s7 + $0x68] sm:$0xff]  ;;  %v1272_v43 = vld [vmem:[%s2370_s7 + $0x40] sm:$0xff] }
 0x156   :  { %1102 = vmatpush1.msra.mxu1 %v897_v46 }
 0x157   :  { %1103 = vmatprep.subr.mxu1 %v894_v47 }
 0x158   :  { %1104 = vmatpush1.msra.mxu1 %v893_v44  ;;  %v844_v44 = vand.u32 64, %v840_v35  ;;  %v1275_v35 = vld [vmem:[%s2370_s7 + $0x58] sm:$0xff] }
 0x159   :  { %1105 = vmatprep.subr.mxu1 %v890_v48 }
 0x15a   :  { %1106 = vmatpush1.msra.mxu1 %v889_v49  ;;  %v823_v49 = vrot.slane %v806_v59, %v822_v27  ;;  %vm2243_vm6 = vcmp.eq.s32.totalorder %v844_v44, 0  ;;  %v1274_v27 = vld [vmem:[%s2370_s7 + $0x50] sm:$0xff]  ;;  %v1268_v44 = vld [vmem:[%s2370_s7 + $0x20] sm:$0xff] }
 0x15b   :  { %1107 = vmatprep.subr.mxu1 %v886_v50 }
 0x15c   :  { %1108 = vmatpush1.msra.mxu1 %v885_v51 }
 0x15d   :  { %1109 = vmatprep.subr.mxu1 %v882_v52 }
 0x15e   :  { %1110 = vmatpush1.msra.mxu1 %v881_v53 }
 0x15f   :  { %1111 = vmatprep.subr.mxu1 %v878_v54 }
 0x160   :  { %1112 = vmatpush1.msra.mxu1 %v877_v55 }
 0x161   :  { %1113 = vmatprep.subr.mxu1 %v874_v56 }
 0x162   :  { %1114 = vmatpush1.msra.mxu1 %v873_v57 }
 0x163   :  { %1115 = vmatprep.subr.mxu1 %v870_v61 }
 0x164   :  { %1116 = vmatpush1.msra.mxu1 %v869_v62 }
 0x165   :  { %1117 = vmatprep.subr.mxu1 %v866_v32 }
 0x166   :  { %1118 = vmatpush1.msra.mxu1 %v865_v2 }
 0x167   :  { %1119 = vmatprep.subr.mxu1 %v862_v6 }
 0x168   :  { %1120 = vmatpush1.msra.mxu1 %v861_v7 }
 0x169   :  { %1121 = vmatprep.subr.mxu1 %v858_v9 }
 0x16a   :  { %1122 = vmatpush1.msra.mxu1 %v857_v11 }
 0x16b   :  { %1543 = vmatprep.subr.mxu1 %v1279_v26 }
 0x1d3   :  { %v557_v39 = vpop.f32.mrf.mxu1 }
 0x1d5   :  { %v559_v5 = vpop.f32.mrf.mxu1 }
 0x1d7   :  { %v563_v8 = vpop.f32.mrf.mxu1 }
 0x1d9   :  { %v565_v10 = vpop.f32.mrf.mxu1 }
 0x1db   :  { %v634_v13 = vpop.f32.mrf.mxu1 }
 0x1dd   :  { %v636_v14 = vpop.f32.mrf.mxu1 }
 0x1df   :  { %v640_v58 = vpop.f32.mrf.mxu1 }
 0x1e1   :  { %v642_v63 = vpop.f32.mrf.mxu1 }
 0x1e3   :  { %v718_v41 = vpop.f32.mrf.mxu1 }
 0x1e4   :  { %v719_v17 = vadd.f32 %v718_v41, %v557_v39 }
 0x1e5   :  { %v720_v4 = vpop.f32.mrf.mxu1 }
 0x1e6   :  { %v721_v21 = vadd.f32 %v720_v4, %v559_v5  ;;  %v2214_v30 = vadd.f32 %v811_v18, %v719_v17 }
 0x1e7   :  { %v724_v19 = vpop.f32.mrf.mxu1 }
 0x1e8   :  { %v725_v23 = vadd.f32 %v724_v19, %v563_v8  ;;  %v2223_v37 = vadd.f32 %v815_v22, %v721_v21 }
 0x1e9   :  { %v726_v24 = vpop.f32.mrf.mxu1 }
 0x1ea   :  { %v2216_v31 = vadd.f32 %v811_v18, %v725_v23  ;;  %v727_v33 = vadd.f32 %v726_v24, %v565_v10 }
 0x1eb   :  { %v795_v34 = vpop.f32.mrf.mxu1 }
 0x1ec   :  { %v2225_v40 = vadd.f32 %v815_v22, %v727_v33  ;;  %v853_v42 = vsel %vm2210_vm3, %v2216_v31, %v2214_v30  ;;  %v796_v38 = vadd.f32 %v795_v34, %v634_v13  ;;  %v849_v2 = vsel %vm2210_vm3, %v2214_v30, %v2216_v31  ;;  %v1278_v33 = vld [vmem:[%s2370_s7 + $0x70] sm:$0xff]  ;;  %v1276_v34 = vld [vmem:[%s2370_s7 + $0x60] sm:$0xff] }
 0x1ed   :  { %v797_v29 = vpop.f32.mrf.mxu1 }
 0x1ee   :  { %v854_v46 = vsel %vm2219_vm4, %v2225_v40, %v2223_v37  ;;  %v798_v48 = vadd.f32 %v797_v29, %v636_v14  ;;  %v2239_v53 = vadd.f32 %v819_v45, %v796_v38  ;;  %v850_v9 = vsel %vm2219_vm4, %v2223_v37, %v2225_v40  ;;  %v1273_v29 = vld [vmem:[%s2370_s7 + $0x48] sm:$0xff]  ;;  %v1271_v38 = vld [vmem:[%s2370_s7 + $0x38] sm:$0xff] }
 0x1ef   :  { %v801_v47 = vpop.f32.mrf.mxu1 }
 0x1f0   :  { %v802_v50 = vadd.f32 %v801_v47, %v640_v58  ;;  %v2247_v57 = vadd.f32 %v823_v49, %v798_v48  ;;  %v1269_v47 = vld [vmem:[%s2370_s7 + $0x28] sm:$0xff]  ;;  %v1267_v48 = vld [vmem:[%s2370_s7 + $0x18] sm:$0xff] }
 0x1f1   :  { %v803_v51 = vpop.f32.mrf.mxu1 }
 0x1f2   :  { %v2241_v54 = vadd.f32 %v819_v45, %v802_v50  ;;  %v804_v55 = vadd.f32 %v803_v51, %v642_v63  ;;  %v1270_v45 = vld [vmem:[%s2370_s7 + $0x30] sm:$0xff]  ;;  %v1265_v50 = vld [vmem:[%s2370_s7 + $0x8] sm:$0xff]  ;;  %v1264_v51 = vld [vmem:[%s2370_s7] sm:$0xff] }
 0x1f4   :  { %v2249_v61 = vadd.f32 %v823_v49, %v804_v55  ;;  %v855_v62 = vsel %vm2235_vm5, %v2241_v54, %v2239_v53  ;;  %v851_v10 = vsel %vm2235_vm5, %v2239_v53, %v2241_v54  ;;  %v1266_v49 = vld [vmem:[%s2370_s7 + $0x10] sm:$0xff] }
 0x1f5   :  { %v1065_v13 = vadd.f32 %v1058_v12, %v851_v10 }
 0x1f6   :  { %v856_v32 = vsel %vm2243_vm6, %v2249_v61, %v2247_v57  ;;  %v852_v14 = vsel %vm2243_vm6, %v2247_v57, %v2249_v61 }
 0x1f7   :  { %v1431_v58 = vmul.f32 -1.442695, %v1065_v13  ;;  %v1066_v0 = vadd.f32 %v1060_v15, %v852_v14  ;;  %v1435_v15 = vld [vmem:[%s2371_s8] ss:$0 sm:$0xff] }
 0x20b   :  { %v987_v6 = vpop.f32.mrf.mxu1 }
 0x20c   :  { %v1063_v7 = vadd.f32 %v987_v6, %v849_v2 }
 0x20d   :  { %v989_v11 = vpop.f32.mrf.mxu1 }
 0x20e   :  { %v1429_v39 = vmul.f32 -1.442695, %v1063_v7  ;;  %v1064_v5 = vadd.f32 %v989_v11, %v850_v9 }
 0x210   :  { %1579 = vpow2.f32 %v1429_v39  ;;  %v1430_v8 = vmul.f32 -1.442695, %v1064_v5 }
 0x212   :  { %1581 = vpow2.f32 %v1430_v8 }
 0x213   :  { %1583 = vpow2.f32 %v1431_v58 }
 0x21d   :  { %v1580_v63 = vpop.eup %1579 }
 0x21e   :  { %v1076_v41 = vadd.f32 1.0, %v1580_v63 }
 0x21f   :  { %v1582_v59 = vpop.eup %1581 }
 0x220   :  { %1585 = vrcp.f32 %v1076_v41  ;;  %v1077_v1 = vadd.f32 1.0, %v1582_v59  ;;  %v1584_v3 = vpop.eup %1583 }
 0x221   :  { %1587 = vtanh.f32 %v1066_v0  ;;  %v1078_v18 = vadd.f32 1.0, %v1584_v3 }
 0x222   :  { %1589 = vrcp.f32 %v1077_v1 }
 0x223   :  { %1591 = vrcp.f32 %v1078_v18 }
 0x22d   :  { %v1586_v4 = vpop.eup %1585 }
 0x22e   :  { %v1588_v16 = vpop.eup %1587 }
 0x22f   :  { %v1590_v17 = vpop.eup %1589  ;;  %v1087_v20 = vmul.f32 %v1588_v16, %v1586_v4 }
 0x230   :  { %v1086_v19 = vmul.f32 0.0, %v1590_v17  ;;  %v1592_v22 = vpop.eup %1591 }
 0x232   :  { %v2275_v21 = vadd.f32 %v1087_v20, %v1086_v19 }
 0x234   :  { %1593 = vtanh.f32 %v2275_v21 }
 0x241   :  { %v1594_v23 = vpop.eup %1593 }
 0x242   :  { %v2278_v24 = vmul.f32 %v1594_v23, %v1592_v22 }
 0x244   :  { %1156 = vmatmul.mubr.f32.vlgmr.msra.gmra.mxu1 %v2278_v24  ;;  %1227 = vmatmul.mubr.f32.vlgmr.msra.gmra.mxu0 %v2278_v24 }
 0x245   :  { %1544 = vmatpush3.msra.mxu1 %v1279_v26 }
 0x246   :  { %1545 = vmatprep.subr.mxu1 %v1278_v33 }
 0x247   :  { %1546 = vmatpush3.msra.mxu1 %v1278_v33 }
 0x248   :  { %1547 = vmatprep.subr.mxu1 %v1277_v25 }
 0x249   :  { %1548 = vmatpush3.msra.mxu1 %v1277_v25 }
 0x24a   :  { %1549 = vmatprep.subr.mxu1 %v1276_v34 }
 0x24b   :  { %1550 = vmatpush3.msra.mxu1 %v1276_v34 }
 0x24c   :  { %1551 = vmatprep.subr.mxu1 %v1275_v35 }
 0x24d   :  { %1552 = vmatpush3.msra.mxu1 %v1275_v35 }
 0x24e   :  { %1553 = vmatprep.subr.mxu1 %v1274_v27 }
 0x24f   :  { %1554 = vmatpush3.msra.mxu1 %v1274_v27 }
 0x250   :  { %1555 = vmatprep.subr.mxu1 %v1273_v29 }
 0x251   :  { %1556 = vmatpush3.msra.mxu1 %v1273_v29 }
 0x252   :  { %1557 = vmatprep.subr.mxu1 %v1272_v43 }
 0x253   :  { %1558 = vmatpush3.msra.mxu1 %v1272_v43 }
 0x254   :  { %1559 = vmatprep.subr.mxu1 %v1271_v38 }
 0x255   :  { %1560 = vmatpush3.msra.mxu1 %v1271_v38 }
 0x256   :  { %1561 = vmatprep.subr.mxu1 %v1270_v45 }
 0x257   :  { %1562 = vmatpush3.msra.mxu1 %v1270_v45 }
 0x258   :  { %1563 = vmatprep.subr.mxu1 %v1269_v47 }
 0x259   :  { %1564 = vmatpush3.msra.mxu1 %v1269_v47 }
 0x25a   :  { %1565 = vmatprep.subr.mxu1 %v1268_v44 }
 0x25b   :  { %1566 = vmatpush3.msra.mxu1 %v1268_v44 }
 0x25c   :  { %1567 = vmatprep.subr.mxu1 %v1267_v48 }
 0x25d   :  { %1568 = vmatpush3.msra.mxu1 %v1267_v48 }
 0x25e   :  { %1569 = vmatprep.subr.mxu1 %v1266_v49 }
 0x25f   :  { %1570 = vmatpush3.msra.mxu1 %v1266_v49 }
 0x260   :  { %1571 = vmatprep.subr.mxu1 %v1265_v50 }
 0x261   :  { %1572 = vmatpush3.msra.mxu1 %v1265_v50 }
 0x262   :  { %1573 = vmatprep.subr.mxu1 %v1264_v51 }
 0x263   :  { %1574 = vmatpush3.msra.mxu1 %v1264_v51 }
 0x304   :  { %v1157_v55 = vpop.f32.mrf.mxu1  ;;  %v1228_v39 = vpop.f32.mrf.mxu0 }
 0x305   :  { %v1233_v2 = vadd.f32 %v1157_v55, %v853_v42  ;;  %v1235_v28 = vadd.f32 %v1228_v39, %v855_v62 }
 0x306   :  { %v1159_v6 = vpop.f32.mrf.mxu1  ;;  %v1230_v30 = vpop.f32.mrf.mxu0 }
 0x307   :  { %v1432_v7 = vmul.f32 -1.442695, %v1233_v2  ;;  %v1234_v9 = vadd.f32 %v1159_v6, %v854_v46  ;;  %v1434_v31 = vmul.f32 -1.442695, %v1235_v28  ;;  %v1236_v36 = vadd.f32 %v1230_v30, %v856_v32 }
 0x309   :  { %1595 = vpow2.f32 %v1432_v7  ;;  %v1433_v11 = vmul.f32 -1.442695, %v1234_v9 }
 0x30b   :  { %1597 = vpow2.f32 %v1433_v11 }
 0x30c   :  { %1599 = vpow2.f32 %v1434_v31 }
 0x30d   :  { %1601 = vtanh.f32 %v1236_v36 }
 0x316   :  { %v1596_v37 = vpop.eup %1595 }
 0x317   :  { %v1246_v40 = vadd.f32 1.0, %v1596_v37 }
 0x318   :  { %v1598_v42 = vpop.eup %1597 }
 0x319   :  { %1603 = vrcp.f32 %v1246_v40  ;;  %v1247_v46 = vadd.f32 1.0, %v1598_v42  ;;  %v1600_v52 = vpop.eup %1599 }
 0x31a   :  { %v1602_v5 = vpop.eup %1601  ;;  %v1248_v8 = vadd.f32 1.0, %v1600_v52 }
 0x31b   :  { %1605 = vrcp.f32 %v1247_v46 }
 0x31c   :  { %1607 = vrcp.f32 %v1248_v8 }
 0x326   :  { %v1604_v53 = vpop.eup %1603 }
 0x327   :  { %v1257_v54 = vmul.f32 %v1604_v53, %v1602_v5 }
 0x328   :  { %v1606_v62 = vpop.eup %1605 }
 0x329   :  { %v1256_v56 = vmul.f32 %v1606_v62, %v2275_v21  ;;  %v1608_v57 = vpop.eup %1607 }
 0x32b   :  { %v1258_v10 = vadd.f32 %v1257_v54, %v1256_v56 }
 0x32d   :  { %1609 = vtanh.f32 %v1258_v10 }
 0x33a   :  { %v1610_v61 = vpop.eup %1609 }
 0x33b   :  { %v1260_v32 = vmul.f32 %v1610_v61, %v1608_v57 }
 0x33d   :  { %v1262_v12 = vsel %vm1261_vm7, %v2278_v24, %v1260_v32  ;;  %v1263_v13 = vsel %vm1261_vm7, %v1260_v32, %v2278_v24 }
 0x33e   :  { %1575 = vmatprep.mubr.f32.mxu1 %v1262_v12 }
 0x33f   :  { %1576 = vmatmul.mubr.f32.vlgmr.msra.gmra.mxu1 %v1263_v13 }
 0x3ff   :  { %v1577_v14 = vpop.f32.mrf.mxu1 }
 0x400   :  { %v1359_v0 = vadd.f32 %v1577_v14, %v1435_v15 }
 0x401   :  { %v1353_v58 = vpop.f32.mrf.mxu1 }
 0x402   :  { %v1354_v63 = vadd.f32 %v1435_v15, %v1353_v58 }
 0x404   :  { %1362 = vmax.xlane.f32.xlu0 %v1354_v63 }
 0x408   :  { %1364 = vmax.xlane.f32.xlu0 %v1359_v0 }
 0x48d   :  { %v1363_v41 = vpop.xlane.xlu0 %1362 }
 0x48e   :  { %v1366_v59 = vsub.f32 %v1354_v63, %v1363_v41 }
 0x490   :  { %v1368_v60 = vmul.f32 1.442695, %v1366_v59 }
 0x491   :  { %v1365_v1 = vpop.xlane.xlu0 %1364 }
 0x492   :  { %v1367_v3 = vsub.f32 %v1359_v0, %v1365_v1  ;;  %1611 = vpow2.f32 %v1368_v60 }
 0x494   :  { %v1370_v4 = vmul.f32 1.442695, %v1367_v3 }
 0x496   :  { %1613 = vpow2.f32 %v1370_v4 }
 0x49f   :  { %v1612_v16 = vpop.eup %1611 }
 0x4a0   :  { %1372 = vadd.xlane.f32.xlu1 %v1612_v16 }
 0x4a3   :  { %v1614_v17 = vpop.eup %1613 }
 0x4a4   :  { %1374 = vadd.xlane.f32.xlu1 %v1614_v17 }
 0x529   :  { %v1373_v18 = vpop.xlane.xlu1 %1372 }
 0x52a   :  { %1615 = vlog2.f32 %v1373_v18 }
 0x52d   :  { %v1375_v19 = vpop.xlane.xlu1 %1374 }
 0x52e   :  { %1617 = vlog2.f32 %v1375_v19 }
 0x537   :  { %v1616_v20 = vpop.eup %1615 }
 0x538   :  { %v1377_v21 = vmul.f32 0.6931472, %v1616_v20 }
 0x53a   :  { %v1380_v22 = vsub.f32 %v1366_v59, %v1377_v21 }
 0x53b   :  { %v1618_v23 = vpop.eup %1617 }
 0x53c   :  { %1382 = vst [vmem:[%s2372_s9] sm:$0xff] %v1380_v22  ;;  %v1379_v24 = vmul.f32 0.6931472, %v1618_v23 }
 0x53e   :  { %v1381_v26 = vsub.f32 %v1367_v3, %v1379_v24 }
 0x540   :  { %1383 = vst [vmem:[%s2372_s9 + $0x8] sm:$0xff] %v1381_v26 }

</bundles_post_ra>
